<compile_context>
chip_gen: v7x
topology: tpu7x:2x2x1
jax: 0.10.0
libtpu: 0.0.40
codegen_flags: <defaults>
</compile_context>

<pallas_src>
import jax
import jax.numpy as jnp
from jax import lax
from jax.experimental import pallas as pl
from jax.experimental.pallas import tpu as pltpu


def _round_up(n, m):
    return (n + m - 1) // m * m


def _make_kernel(chunk_rows, n_chunks):
    def mlp_kernel(x_ref, w1_ref, b1_ref, w2_ref, b2_ref, w3_ref, b3_ref, o_ref):
        # Weights/biases are tiny and VMEM-resident; load once per grid step.
        w1 = w1_ref[...]          # [G*F, G*5]  stream dtype (e.g. bf16)
        b1 = b1_ref[...]          # [1,   G*5]  f32
        w2 = w2_ref[...]          # [G*5, G*5]  f32
        b2 = b2_ref[...]          # [1,   G*5]  f32
        w3 = w3_ref[...]          # [G*5, G  ]  f32
        b3 = b3_ref[...]          # [1,   G  ]  f32

        def body(c, carry):
            r0 = pl.multiple_of(c * chunk_rows, chunk_rows)
            xc = x_ref[pl.ds(r0, chunk_rows), :]            # [C, G*F], batch on sublanes
            # Layer 1: bf16 MXU matmul, f32 accumulation.
            h1 = jnp.dot(xc, w1, preferred_element_type=jnp.float32)
            h1 = jnp.maximum(h1 + b1, 0.0)
            # Layers 2/3: tiny f32 matmuls.
            h2 = jnp.dot(h1, w2, preferred_element_type=jnp.float32)
            h2 = jnp.maximum(h2 + b2, 0.0)
            h3 = jnp.dot(h2, w3, preferred_element_type=jnp.float32) + b3
            # Exact sigmoid (plenty of EUP/VALU slack; kernel is HBM-bound).
            o_ref[pl.ds(r0, chunk_rows), :] = (
                1.0 / (1.0 + jnp.exp(-h3))).astype(o_ref.dtype)
            return carry

        lax.fori_loop(0, n_chunks, body, 0)

    return mlp_kernel


def custom_network_forward(x, params, *, x_stream_dtype=jnp.bfloat16,
                           tile_x_bytes=4 << 20, chunk_rows_max=512):
    """Fused forward pass of CustomNetwork.

    x: [B, F] float; streamed to the kernel in `x_stream_dtype` (default bf16,
       which halves the only significant HBM stream; all accumulation is f32).
    params: PyTorch-layout weights:
        w1 [5, F], b1 [5], w2 [5, 5], b2 [5], w3 [1, 5], b3 [1]
    returns: [B, 1] float32
    """
    B, F = x.shape
    x = x.astype(x_stream_dtype)
    itemsize = jnp.dtype(x_stream_dtype).itemsize

    # Lane-dense repack: fold G consecutive batch rows into one 128-lane row.
    G = 128 // F if (F <= 128 and 128 % F == 0) else 1
    gf = G * F

    # Block-diagonal (Kronecker) weights so every matmul is [m,k] @ [k,n] with
    # the batch on sublanes; w1 is pre-cast to the streaming dtype.
    def kron_w(w, dtype):
        return jnp.kron(jnp.eye(G, dtype=dtype), w.astype(dtype).T)

    def tile_b(b):
        return jnp.tile(b.astype(jnp.float32).reshape(1, -1), (1, G))

    w1 = kron_w(params["w1"], x_stream_dtype)       # [G*F, G*5]
    w2 = kron_w(params["w2"], jnp.float32)          # [G*5, G*5]
    w3 = kron_w(params["w3"], jnp.float32)          # [G*5, G  ]
    b1, b2, b3 = tile_b(params["b1"]), tile_b(params["b2"]), tile_b(params["b3"])
    out_cols = G * params["w3"].shape[0]            # = G

    # --- batch tiling over the repacked rows --------------------------------
    rows = -(-B // G)
    budget_rows = max(8, tile_x_bytes // (gf * itemsize))      # byte-budget tile
    half_rows = _round_up(max(1, -(-rows // 2)), 8)            # >=2 tiles (v7x 2 TCs)
    tile_rows = max(8, min(_round_up(budget_rows, 8), half_rows))
    chunk_rows = min(chunk_rows_max, tile_rows)
    tile_rows = _round_up(tile_rows, chunk_rows)
    rows_pad = _round_up(rows, tile_rows)
    num_tiles = rows_pad // tile_rows
    n_chunks = tile_rows // chunk_rows

    b_pad = rows_pad * G
    if b_pad != B:
        x = jnp.pad(x, ((0, b_pad - B), (0, 0)))
    x2 = x.reshape(rows_pad, gf)                    # free: rows are contiguous

    # VMEM budget: double-buffered x tile + (lane-padded) out tile + slack.
    x_tile_bytes = tile_rows * gf * itemsize
    o_tile_bytes = tile_rows * _round_up(out_cols, 128) * 4
    vmem_limit = int(max(16 << 20, 2 * (x_tile_bytes + o_tile_bytes) + (4 << 20)))

    cost = pl.CostEstimate(
        flops=int(2 * B * (F * 5 + 5 * 5 + 5 * 1)),
        transcendentals=int(B),
        bytes_accessed=int(B * F * itemsize + B * 4 +
                           w1.size * itemsize + (w2.size + w3.size) * 4),
    )

    kernel = _make_kernel(chunk_rows, n_chunks)

    out = pl.pallas_call(
        kernel,
        out_shape=jax.ShapeDtypeStruct((rows_pad, out_cols), jnp.float32),
        grid=(num_tiles,),
        in_specs=[
            pl.BlockSpec((tile_rows, gf), lambda i: (i, 0)),   # streamed x tiles
            pl.BlockSpec(w1.shape, lambda i: (0, 0)),          # resident weights
            pl.BlockSpec(b1.shape, lambda i: (0, 0)),
            pl.BlockSpec(w2.shape, lambda i: (0, 0)),
            pl.BlockSpec(b2.shape, lambda i: (0, 0)),
            pl.BlockSpec(w3.shape, lambda i: (0, 0)),
            pl.BlockSpec(b3.shape, lambda i: (0, 0)),
        ],
        out_specs=pl.BlockSpec((tile_rows, out_cols), lambda i: (i, 0)),
        compiler_params=pltpu.CompilerParams(
            dimension_semantics=("parallel",),
            vmem_limit_bytes=vmem_limit),
        cost_estimate=cost,
    )(x2, w1, b1, w2, b2, w3, b3)

    return out.reshape(b_pad, 1)[:B]


def init_params(key, input_size):
    """PyTorch nn.Linear-style init; weights kept in PyTorch [out, in] layout."""
    def linear(k, fan_in, fan_out):
        kw, kb = jax.random.split(k)
        bound = 1.0 / jnp.sqrt(fan_in)
        w = jax.random.uniform(kw, (fan_out, fan_in), jnp.float32, -bound, bound)
        b = jax.random.uniform(kb, (fan_out,), jnp.float32, -bound, bound)
        return w, b

    k1, k2, k3 = jax.random.split(key, 3)
    w1, b1 = linear(k1, input_size, 5)
    w2, b2 = linear(k2, 5, 5)
    w3, b3 = linear(k3, 5, 1)
    return {"w1": w1, "b1": b1, "w2": w2, "b2": b2, "w3": w3, "b3": b3}


if __name__ == "__main__":
    key = jax.random.PRNGKey(0)
    input_size = 32
    batch = 512            # small demo: repacks to 128 rows of 128 lanes, 2 grid tiles

    kx, kp = jax.random.split(key)
    x = jax.random.normal(kx, (batch, input_size), jnp.float32)
    params = init_params(kp, input_size)

    out = custom_network_forward(x, params)
    out = jax.block_until_ready(out)

    # Pure-JAX reference using the same bf16 rounding of x / w1 (f32 math).
    xr = x.astype(jnp.bfloat16).astype(jnp.float32)
    w1r = params["w1"].astype(jnp.bfloat16).astype(jnp.float32)
    h1 = jnp.maximum(xr @ w1r.T + params["b1"], 0.0)
    h2 = jnp.maximum(h1 @ params["w2"].T + params["b2"], 0.0)
    ref = jax.nn.sigmoid(h2 @ params["w3"].T + params["b3"])

    assert out.shape == (batch, 1)
    assert jnp.allclose(out, ref, atol=5e-3, rtol=5e-3), float(
        jnp.max(jnp.abs(out - ref)))

    print("KERNEL_OK")
</pallas_src>

<mosaic_0001>
module attributes {stable_mosaic.version = 11 : i64} {
  func.func @mlp_kernel(%arg0: i32, %arg1: memref<64x128xbf16, #tpu.memory_space<vmem>>, %arg2: memref<128x20xbf16, #tpu.memory_space<vmem>>, %arg3: memref<1x20xf32, #tpu.memory_space<vmem>>, %arg4: memref<20x20xf32, #tpu.memory_space<vmem>>, %arg5: memref<1x20xf32, #tpu.memory_space<vmem>>, %arg6: memref<20x4xf32, #tpu.memory_space<vmem>>, %arg7: memref<1x4xf32, #tpu.memory_space<vmem>>, %arg8: memref<64x4xf32, #tpu.memory_space<vmem>>) attributes {dimension_semantics = [#tpu.dimension_semantics<parallel>], iteration_bounds = array<i64: 2>, scalar_prefetch = 0 : i64, scratch_operands = 0 : i64, tpu.core_type = #tpu.core_type<tc>, window_params = [{transform_indices = @transform_0, window_bounds = array<i64: 64, 128>}, {pipeline_mode = #tpu.pipeline_mode<synchronous>, transform_indices = @transform_1, window_bounds = array<i64: 128, 20>}, {pipeline_mode = #tpu.pipeline_mode<synchronous>, transform_indices = @transform_2, window_bounds = array<i64: 1, 20>}, {pipeline_mode = #tpu.pipeline_mode<synchronous>, transform_indices = @transform_3, window_bounds = array<i64: 20, 20>}, {pipeline_mode = #tpu.pipeline_mode<synchronous>, transform_indices = @transform_4, window_bounds = array<i64: 1, 20>}, {pipeline_mode = #tpu.pipeline_mode<synchronous>, transform_indices = @transform_5, window_bounds = array<i64: 20, 4>}, {pipeline_mode = #tpu.pipeline_mode<synchronous>, transform_indices = @transform_6, window_bounds = array<i64: 1, 4>}, {transform_indices = @transform_7, window_bounds = array<i64: 64, 4>}]} {
    %c0 = arith.constant 0 : index
    %c0_0 = arith.constant 0 : index
    %0 = vector.load %arg2[%c0, %c0_0] : memref<128x20xbf16, #tpu.memory_space<vmem>>, vector<128x20xbf16>
    %c0_1 = arith.constant 0 : index
    %c0_2 = arith.constant 0 : index
    %1 = vector.load %arg3[%c0_1, %c0_2] : memref<1x20xf32, #tpu.memory_space<vmem>>, vector<1x20xf32>
    %c0_3 = arith.constant 0 : index
    %c0_4 = arith.constant 0 : index
    %2 = vector.load %arg4[%c0_3, %c0_4] : memref<20x20xf32, #tpu.memory_space<vmem>>, vector<20x20xf32>
    %c0_5 = arith.constant 0 : index
    %c0_6 = arith.constant 0 : index
    %3 = vector.load %arg5[%c0_5, %c0_6] : memref<1x20xf32, #tpu.memory_space<vmem>>, vector<1x20xf32>
    %c0_7 = arith.constant 0 : index
    %c0_8 = arith.constant 0 : index
    %4 = vector.load %arg6[%c0_7, %c0_8] : memref<20x4xf32, #tpu.memory_space<vmem>>, vector<20x4xf32>
    %c0_9 = arith.constant 0 : index
    %c0_10 = arith.constant 0 : index
    %5 = vector.load %arg7[%c0_9, %c0_10] : memref<1x4xf32, #tpu.memory_space<vmem>>, vector<1x4xf32>
    %c0_i32 = arith.constant 0 : i32
    %c64_i32 = arith.constant 64 : i32
    %6 = arith.muli %c0_i32, %c64_i32 : i32
    %7 = tpu.assume_multiple %6, 64 : i32
    %8 = arith.index_cast %7 : i32 to index
    %c0_11 = arith.constant 0 : index
    %9 = vector.load %arg1[%8, %c0_11] : memref<64x128xbf16, #tpu.memory_space<vmem>>, vector<64x128xbf16>
    %cst = arith.constant dense<0.000000e+00> : vector<64x20xf32>
    %10 = tpu.matmul %9, %0, %cst {dimension_numbers = #tpu.dot_dimension_numbers<[1], [0], [0], [1], [0, 0, 1, 1], [], []>} : vector<64x128xbf16>, vector<128x20xbf16>, vector<64x20xf32> -> vector<64x20xf32>
    %11 = vector.broadcast %1 : vector<1x20xf32> to vector<64x20xf32>
    %12 = arith.addf %10, %11 : vector<64x20xf32>
    %cst_12 = arith.constant 0.000000e+00 : f32
    %13 = vector.broadcast %cst_12 : f32 to vector<64x20xf32>
    %14 = arith.maximumf %12, %13 : vector<64x20xf32>
    %cst_13 = arith.constant dense<0.000000e+00> : vector<64x20xf32>
    %15 = tpu.matmul %14, %2, %cst_13 {dimension_numbers = #tpu.dot_dimension_numbers<[1], [0], [0], [1], [0, 0, 1, 1], [], []>} : vector<64x20xf32>, vector<20x20xf32>, vector<64x20xf32> -> vector<64x20xf32>
    %16 = vector.broadcast %3 : vector<1x20xf32> to vector<64x20xf32>
    %17 = arith.addf %15, %16 : vector<64x20xf32>
    %cst_14 = arith.constant 0.000000e+00 : f32
    %18 = vector.broadcast %cst_14 : f32 to vector<64x20xf32>
    %19 = arith.maximumf %17, %18 : vector<64x20xf32>
    %cst_15 = arith.constant dense<0.000000e+00> : vector<64x4xf32>
    %20 = tpu.matmul %19, %4, %cst_15 {dimension_numbers = #tpu.dot_dimension_numbers<[1], [0], [0], [1], [0, 0, 1, 1], [], []>} : vector<64x20xf32>, vector<20x4xf32>, vector<64x4xf32> -> vector<64x4xf32>
    %21 = vector.broadcast %5 : vector<1x4xf32> to vector<64x4xf32>
    %22 = arith.addf %20, %21 : vector<64x4xf32>
    %cst_16 = arith.constant 0.000000e+00 : f32
    %23 = vector.broadcast %cst_16 : f32 to vector<64x4xf32>
    %24 = arith.subf %23, %22 : vector<64x4xf32>
    %25 = math.exp %24 : vector<64x4xf32>
    %cst_17 = arith.constant 1.000000e+00 : f32
    %26 = vector.broadcast %cst_17 : f32 to vector<64x4xf32>
    %27 = arith.addf %26, %25 : vector<64x4xf32>
    %cst_18 = arith.constant 1.000000e+00 : f32
    %28 = vector.broadcast %cst_18 : f32 to vector<64x4xf32>
    %29 = arith.divf %28, %27 : vector<64x4xf32>
    %30 = arith.index_cast %7 : i32 to index
    %c0_19 = arith.constant 0 : index
    %31 = vector.load %arg8[%30, %c0_19] : memref<64x4xf32, #tpu.memory_space<vmem>>, vector<64x4xf32>
    tpu.vector_store %arg8[%30, %c0_19], %29 {strides = array<i32>} : memref<64x4xf32, #tpu.memory_space<vmem>>, vector<64x4xf32>,
    %c1_i32 = arith.constant 1 : i32
    return
  }
  func.func @transform_0(%arg0: i32) -> (i32, i32) {
    %c0_i32 = arith.constant 0 : i32
    %c0_i32_0 = arith.constant 0 : i32
    return %arg0, %c0_i32 : i32, i32
  }
  func.func @transform_1(%arg0: i32) -> (i32, i32) {
    %c0_i32 = arith.constant 0 : i32
    %c0_i32_0 = arith.constant 0 : i32
    %c0_i32_1 = arith.constant 0 : i32
    return %c0_i32, %c0_i32_0 : i32, i32
  }
  func.func @transform_2(%arg0: i32) -> (i32, i32) {
    %c0_i32 = arith.constant 0 : i32
    %c0_i32_0 = arith.constant 0 : i32
    %c0_i32_1 = arith.constant 0 : i32
    return %c0_i32, %c0_i32_0 : i32, i32
  }
  func.func @transform_3(%arg0: i32) -> (i32, i32) {
    %c0_i32 = arith.constant 0 : i32
    %c0_i32_0 = arith.constant 0 : i32
    %c0_i32_1 = arith.constant 0 : i32
    return %c0_i32, %c0_i32_0 : i32, i32
  }
  func.func @transform_4(%arg0: i32) -> (i32, i32) {
    %c0_i32 = arith.constant 0 : i32
    %c0_i32_0 = arith.constant 0 : i32
    %c0_i32_1 = arith.constant 0 : i32
    return %c0_i32, %c0_i32_0 : i32, i32
  }
  func.func @transform_5(%arg0: i32) -> (i32, i32) {
    %c0_i32 = arith.constant 0 : i32
    %c0_i32_0 = arith.constant 0 : i32
    %c0_i32_1 = arith.constant 0 : i32
    return %c0_i32, %c0_i32_0 : i32, i32
  }
  func.func @transform_6(%arg0: i32) -> (i32, i32) {
    %c0_i32 = arith.constant 0 : i32
    %c0_i32_0 = arith.constant 0 : i32
    %c0_i32_1 = arith.constant 0 : i32
    return %c0_i32, %c0_i32_0 : i32, i32
  }
  func.func @transform_7(%arg0: i32) -> (i32, i32) {
    %c0_i32 = arith.constant 0 : i32
    %c0_i32_0 = arith.constant 0 : i32
    return %arg0, %c0_i32 : i32, i32
  }
}

</mosaic_0001>

<bundles_post_ra>
// kernel: tpu_custom_call.1
= control target key start
LH: loop header
LB: loop body
LE: loop exit
PB: predicated region body
PF: predicated region fallthrough
CT: control target
= control target key end

     0   :  { %s1112_s24 = smov 0   ;;  %s1212_s0 = inlined_call_operand.vmem [shape: bf16[128,128], index: 0, kind: input, shape index: {}]   ;;  %s1213_s1 = inlined_call_operand.vmem [shape: bf16[128,20], index: 1, kind: input, shape index: {}]   ;;  %s1214_s2 = inlined_call_operand.vmem [shape: f32[1,20], index: 2, kind: input, shape index: {}]   ;;  %s1215_s3 = inlined_call_operand.vmem [shape: f32[20,20], index: 3, kind: input, shape index: {}]   ;;  %s1216_s4 = inlined_call_operand.vmem [shape: f32[1,20], index: 4, kind: input, shape index: {}]   ;;  %s1217_s5 = inlined_call_operand.vmem [shape: f32[20,4], index: 5, kind: input, shape index: {}]   ;;  %s1218_s6 = inlined_call_operand.vmem [shape: f32[1,4], index: 6, kind: input, shape index: {}]   ;;  %s1219_s7 = inlined_call_operand.vmem [shape: f32[128,4], index: 7, kind: output, shape index: {}]  }
   0x1 LB: > { %s866_s25 = sadd.s32 4294967295, %s1070_s24   ;;  %p870_p0 = scmp.ge.s32.totalorder %s1070_s24, 1  ;;  %s1070_s24 = sphi %s1112_s24, %s17_s24  }
   0x2   : > { %p238_p1 = scmp.lt.s32.totalorder %s1070_s24, 3 }
   0x4   : > { %p239_p2 = pnand %p870_p0, %p238_p1 }
   0x5   : > { %v1020_v0 = vld [vmem:[%s1213_s1] sm:$0xff] (!%p239_p2)   ;;  %s871_s28 = sshll.u32 (!%p239_p2), %s866_s25, 3  ;;  %v1021_v1 = vld [vmem:[%s1213_s1 + $0x8] sm:$0xff] (!%p239_p2)   ;;  %v1022_v2 = vld [vmem:[%s1213_s1 + $0x10] sm:$0xff] (!%p239_p2)   ;;  %vm498_vm0 = vcmask (!%p239_p2), 1043456   ;;  %vm473_vm1 = vcmask (!%p239_p2), 162816  }
   0x6   : > { %242 = sbr.rel (%p239_p2) target bundleno = 733 (0x2dd), region = 48  ;;  %p271_p3 = scmp.lt.s32.totalorder (!%p239_p2), %s871_s28, 15  ;;  %944 = vmatprep.subr.bf16.mxu0 (!%p239_p2), %v1020_v0  ;;  %v1023_v3 = vld [vmem:[%s1213_s1 + $0x18] sm:$0xff] (!%p239_p2)   ;;  %v1024_v5 = vld [vmem:[%s1213_s1 + $0x20] sm:$0xff] (!%p239_p2)   ;;  %v1025_v6 = vld [vmem:[%s1213_s1 + $0x28] sm:$0xff] (!%p239_p2)   ;;  %vm801_vm2 = vcmask (!%p239_p2), 31744  }
   0x7   : > { %945 = vmatpush3.bf16.msra.mxu0 (!%p239_p2), %v1020_v0  ;;  %v1026_v7 = vld [vmem:[%s1213_s1 + $0x30] sm:$0xff] (!%p239_p2)   ;;  %v1027_v8 = vld [vmem:[%s1213_s1 + $0x38] sm:$0xff] (!%p239_p2)   ;;  %v300_v12 = vld [vmem:[%s1215_s3] sm:$0xff] (!%p239_p2) }
   0x8   : > { %946 = vmatprep.subr.bf16.mxu0 (!%p239_p2), %v1021_v1  ;;  %v301_v13 = vld [vmem:[%s1215_s3 + $0x8] sm:$0xff] (!%p239_p2)  ;;  %v302_v15 = vld [vmem:[%s1215_s3 + $0x10] sm:$0xf] (!%p239_p2)  ;;  %v304_v16 = vld [vmem:[%s1217_s5] sm:$0xff] (!%p239_p2) }
   0x9   : > { %v1004_v14 = vpack.c.bf16 (!%p239_p2), %v301_v13, %v300_v12  ;;  %v305_v17 = vld [vmem:[%s1217_s5 + $0x8] sm:$0xff] (!%p239_p2)  ;;  %v875_v19 = vld [vmem:[%s1214_s2] ss:$0 sm:$0xff] (!%p239_p2)  ;;  %v306_v31 = vld [vmem:[%s1217_s5 + $0x10] sm:$0xf] (!%p239_p2) }
   0xa   : > { %v1008_v18 = vpack.c.bf16 (!%p239_p2), %v305_v17, %v304_v16  ;;  %v888_v45 = vld [vmem:[%s1216_s4] ss:$0 sm:$0xff] (!%p239_p2) }
   0xb   : > { %947 = vmatpush3.bf16.msra.mxu0 (!%p239_p2), %v1021_v1  ;;  %1005 = vmatprep.subr.bf16.mxu1 (!%p239_p2), %v1004_v14 }
   0xc   : > { %948 = vmatprep.subr.bf16.mxu0 (!%p239_p2), %v1022_v2  ;;  %1007 = vmatpush3.bf16.msra.mxu1 (!%p239_p2), %v1004_v14 }
   0xd   : > { %s1221_s28 = smov (!%p271_p3, %s871_s28), 15  ;;  %972 = vmatprep.subr.msk.mxu1 %vm498_vm0, %v302_v15 }
   0xe   : > { %s872_s10 = sshll.u32 %s1221_s28, 2  ;;  %s874_s21 = sshll.u32 %s1221_s28, 3 }
   0xf   : > { %s274_s13 = scalar_lea.vmem %s1212_s0, %s872_s10  ;;  %949 = vmatpush3.bf16.msra.mxu0 %v1022_v2  ;;  %s280_s25 = scalar_lea.vmem %s1219_s7, %s874_s21 }
  0x10   : > { %v1028_v4 = vld [vmem:[%s274_s13] sm:$0xff]   ;;  %950 = vmatprep.subr.bf16.mxu0 %v1023_v3  ;;  %v1029_v9 = vld [vmem:[%s274_s13 + $0x8] sm:$0xff]   ;;  %v1030_v10 = vld [vmem:[%s274_s13 + $0x10] sm:$0xff]   ;;  %973 = vmatpush3.msk.msra.mxu1 %vm498_vm0, %v302_v15 }
  0x11   : > { %960 = vmatprep.mubr.bf16.mxu0 %v1028_v4  ;;  %v1031_v11 = vld [vmem:[%s274_s13 + $0x18] sm:$0xff]   ;;  %1009 = vmatprep.subr.bf16.mxu1 %v1008_v18 }
  0x13   : > { %951 = vmatpush3.bf16.msra.mxu0 %v1023_v3 }
  0x14   : > { %952 = vmatprep.subr.bf16.mxu0 %v1024_v5 }
  0x17   : > { %953 = vmatpush3.bf16.msra.mxu0 %v1024_v5 }
  0x18   : > { %954 = vmatprep.subr.bf16.mxu0 %v1025_v6 }
  0x1b   : > { %955 = vmatpush3.bf16.msra.mxu0 %v1025_v6  ;;  %v898_v6 = vld [vmem:[%s1218_s6] ss:$0 sm:$0xff] }
  0x1c   : > { %956 = vmatprep.subr.bf16.mxu0 %v1026_v7 }
  0x1f   : > { %957 = vmatpush3.bf16.msra.mxu0 %v1026_v7 }
  0x20   : > { %958 = vmatprep.subr.bf16.mxu0 %v1027_v8 }
  0x23   : > { %959 = vmatpush3.bf16.msra.mxu0 %v1027_v8 }
  0x26   : > { %961 = vmatmul.mubr.bf16.vlgmr.msra.gmra.mrb[0].mxu0 %v1029_v9 }
  0x27   : > { %964 = vmatprep.mubr.bf16.mxu0 %v1030_v10 }
  0x2e   : > { %965 = vmatmul.mubr.bf16.gmra.mrb[4].mxu0 %v1031_v11 }
  0xf9   : > { %v962_v20 = vpop.f32.mrb[0].mxu0 }
  0xfa   : > { %v428_v21 = vpop.f32.mrb[1].mxu0  ;;  %v437_v24 = vadd.f32 %v962_v20, %v875_v19 }
  0xfb   : > { %v429_v22 = vadd.f32 %v875_v19, %v428_v21  ;;  %v963_v23 = vpop.f32.mrb[2].mxu0 }
  0xfc   : > { %v431_v25 = vpop.f32.mrb[3].mxu0  ;;  %v440_v28 = vadd.f32 %v963_v23, %v875_v19  ;;  %v461_v30 = vmax.f32 %v437_v24, 0.0 }
  0xfd   : > { %v459_v26 = vmax.f32 %v429_v22, 0.0  ;;  %v432_v27 = vadd.f32 %v875_v19, %v431_v25 }
  0xfe   : > { %v462_v34 = vmax.f32 %v440_v28, 0.0 }
  0xff   : > { %v460_v29 = vmax.f32 %v432_v27, 0.0  ;;  %974 = vmatprep.mubr.msk.f32.mxu1 %vm473_vm1, %v459_v26 }
 0x101   : > { %v966_v32 = vpop.f32.mrb[4].mxu0  ;;  %975 = vmatmul.mubr.msk.f32.vlgmr.msra.gmra.mrb[0].mxu1 %vm473_vm1, %v460_v29 }
 0x102   : > { %v444_v33 = vpop.f32.mrb[5].mxu0  ;;  %977 = vmatprep.mubr.msk.f32.mxu1 %vm473_vm1, %v461_v30  ;;  %1011 = vmatpush3.bf16.msra.mxu1 %v1008_v18  ;;  %v453_v37 = vadd.f32 %v966_v32, %v875_v19 }
 0x103   : > { %v445_v35 = vadd.f32 %v875_v19, %v444_v33  ;;  %v967_v36 = vpop.f32.mrb[6].mxu0  ;;  %990 = vmatprep.subr.msk.mxu1 %vm498_vm0, %v306_v31 }
 0x104   : > { %v447_v38 = vpop.f32.mrb[7].mxu0  ;;  %v456_v41 = vadd.f32 %v967_v36, %v875_v19  ;;  %v465_v43 = vmax.f32 %v453_v37, 0.0 }
 0x105   : > { %v463_v39 = vmax.f32 %v445_v35, 0.0  ;;  %v448_v40 = vadd.f32 %v875_v19, %v447_v38  ;;  %978 = vmatmul.mubr.msk.f32.gmra.mrb[2].mxu1 %vm473_vm1, %v462_v34 }
 0x106   : > { %991 = vmatpush3.msk.msra.mxu1 %vm498_vm0, %v306_v31  ;;  %v466_v44 = vmax.f32 %v456_v41, 0.0 }
 0x107   : > { %v464_v42 = vmax.f32 %v448_v40, 0.0  ;;  %980 = vmatprep.mubr.msk.f32.mxu1 %vm473_vm1, %v463_v39 }
 0x109   : > { %981 = vmatmul.mubr.msk.f32.gmra.mrb[4].mxu1 %vm473_vm1, %v464_v42 }
 0x10a   : > { %983 = vmatprep.mubr.msk.f32.mxu1 %vm473_vm1, %v465_v43 }
 0x10d   : > { %984 = vmatmul.mubr.msk.f32.gmra.mrb[6].mxu1 %vm473_vm1, %v466_v44 }
 0x1d4   : > { %v976_v46 = vpop.f32.mrb[0].mxu1 }
 0x1d5   : > { %v574_v47 = vadd.f32 %v976_v46, %v888_v45  ;;  %v568_v48 = vpop.f32.mrb[1].mxu1 }
 0x1d6   : > { %v569_v49 = vadd.f32 %v888_v45, %v568_v48 }
 0x1d7   : > { %v608_v52 = vmax.f32 %v574_v47, 0.0 }
 0x1d8   : > { %v607_v50 = vmax.f32 %v569_v49, 0.0  ;;  %v979_v51 = vpop.f32.mrb[2].mxu1 }
 0x1d9   : > { %v584_v53 = vadd.f32 %v979_v51, %v888_v45  ;;  %v578_v54 = vpop.f32.mrb[3].mxu1 }
 0x1da   : > { %v579_v55 = vadd.f32 %v888_v45, %v578_v54  ;;  %992 = vmatprep.mubr.msk.f32.mxu1 %vm473_vm1, %v607_v50 }
 0x1db   : > { %993 = vmatmul.mubr.msk.f32.vlgmr.msra.gmra.mrb[8].mxu1 %vm473_vm1, %v608_v52  ;;  %v610_v58 = vmax.f32 %v584_v53, 0.0 }
 0x1dc   : > { %v609_v56 = vmax.f32 %v579_v55, 0.0  ;;  %v982_v57 = vpop.f32.mrb[4].mxu1 }
 0x1dd   : > { %v594_v59 = vadd.f32 %v982_v57, %v888_v45  ;;  %v588_v60 = vpop.f32.mrb[5].mxu1 }
 0x1de   : > { %v589_v61 = vadd.f32 %v888_v45, %v588_v60  ;;  %995 = vmatprep.mubr.msk.f32.mxu1 %vm473_vm1, %v609_v56 }
 0x1df   : > { %996 = vmatmul.mubr.msk.f32.gmra.mrb[10].mxu1 %vm473_vm1, %v610_v58  ;;  %v612_v0 = vmax.f32 %v594_v59, 0.0 }
 0x1e0   : > { %v611_v62 = vmax.f32 %v589_v61, 0.0  ;;  %v985_v63 = vpop.f32.mrb[6].mxu1 }
 0x1e1   : > { %v604_v1 = vadd.f32 %v985_v63, %v888_v45  ;;  %v598_v2 = vpop.f32.mrb[7].mxu1 }
 0x1e2   : > { %v599_v3 = vadd.f32 %v888_v45, %v598_v2  ;;  %998 = vmatprep.mubr.msk.f32.mxu1 %vm473_vm1, %v611_v62 }
 0x1e3   : > { %999 = vmatmul.mubr.msk.f32.gmra.mrb[12].mxu1 %vm473_vm1, %v612_v0  ;;  %v614_v5 = vmax.f32 %v604_v1, 0.0 }
 0x1e4   : > { %v613_v4 = vmax.f32 %v599_v3, 0.0 }
 0x1e6   : > { %1001 = vmatprep.mubr.msk.f32.mxu1 %vm473_vm1, %v613_v4 }
 0x1e7   : > { %1002 = vmatmul.mubr.msk.f32.gmra.mrb[14].mxu1 %vm473_vm1, %v614_v5 }
 0x2ae   : > { %v994_v7 = vpop.f32.mrb[8].mxu1 }
 0x2af   : > { %v720_v8 = vadd.f32 %v994_v7, %v898_v6  ;;  %v714_v9 = vpop.f32.mrb[9].mxu1 }
 0x2b0   : > { %v715_v10 = vadd.f32 %v898_v6, %v714_v9 }
 0x2b1   : > { %v754_v11 = vsub.f32 0.0, %v720_v8 }
 0x2b2   : > { %v753_v12 = vsub.f32 0.0, %v715_v10  ;;  %v997_v13 = vpop.f32.mrb[10].mxu1 }
 0x2b3   : > { %v763_v14 = vmul.f32 1.442695, %v754_v11  ;;  %v730_v15 = vadd.f32 %v997_v13, %v898_v6  ;;  %v724_v16 = vpop.f32.mrb[11].mxu1 }
 0x2b4   : > { %v761_v17 = vmul.f32 1.442695, %v753_v12  ;;  %v725_v18 = vadd.f32 %v898_v6, %v724_v16 }
 0x2b5   : > { %1032 = vpow2.f32 %v763_v14  ;;  %v756_v19 = vsub.f32 0.0, %v730_v15 }
 0x2b6   : > { %1034 = vpow2.f32 %v761_v17  ;;  %v755_v20 = vsub.f32 0.0, %v725_v18  ;;  %v1000_v21 = vpop.f32.mrb[12].mxu1 }
 0x2b7   : > { %v767_v22 = vmul.f32 1.442695, %v756_v19  ;;  %v740_v23 = vadd.f32 %v1000_v21, %v898_v6  ;;  %v734_v24 = vpop.f32.mrb[13].mxu1 }
 0x2b8   : > { %v765_v25 = vmul.f32 1.442695, %v755_v20  ;;  %v735_v26 = vadd.f32 %v898_v6, %v734_v24 }
 0x2b9   : > { %1036 = vpow2.f32 %v767_v22  ;;  %v758_v27 = vsub.f32 0.0, %v740_v23 }
 0x2ba   : > { %1038 = vpow2.f32 %v765_v25  ;;  %v757_v28 = vsub.f32 0.0, %v735_v26  ;;  %v1003_v29 = vpop.f32.mrb[14].mxu1 }
 0x2bb   : > { %v771_v30 = vmul.f32 1.442695, %v758_v27  ;;  %v750_v31 = vadd.f32 %v1003_v29, %v898_v6  ;;  %v744_v32 = vpop.f32.mrb[15].mxu1 }
 0x2bc   : > { %v769_v33 = vmul.f32 1.442695, %v757_v28  ;;  %v745_v34 = vadd.f32 %v898_v6, %v744_v32 }
 0x2bd   : > { %1040 = vpow2.f32 %v771_v30  ;;  %v760_v35 = vsub.f32 0.0, %v750_v31 }
 0x2be   : > { %1042 = vpow2.f32 %v769_v33  ;;  %v759_v36 = vsub.f32 0.0, %v745_v34 }
 0x2bf   : > { %v1033_v37 = vpop.eup %1032  ;;  %v775_v38 = vmul.f32 1.442695, %v760_v35 }
 0x2c0   : > { %v1035_v39 = vpop.eup %1034  ;;  %v778_v40 = vadd.f32 1.0, %v1033_v37  ;;  %v773_v41 = vmul.f32 1.442695, %v759_v36 }
 0x2c1   : > { %v777_v42 = vadd.f32 1.0, %v1035_v39  ;;  %1044 = vpow2.f32 %v775_v38 }
 0x2c2   : > { %1046 = vrcp.f32 %v778_v40 }
 0x2c3   : > { %v1037_v43 = vpop.eup %1036  ;;  %1048 = vrcp.f32 %v777_v42 }
 0x2c4   : > { %v1039_v44 = vpop.eup %1038  ;;  %v780_v45 = vadd.f32 1.0, %v1037_v43  ;;  %1050 = vpow2.f32 %v773_v41 }
 0x2c5   : > { %v779_v46 = vadd.f32 1.0, %v1039_v44 }
 0x2c6   : > { %1052 = vrcp.f32 %v780_v45 }
 0x2c7   : > { %v1041_v47 = vpop.eup %1040  ;;  %1054 = vrcp.f32 %v779_v46 }
 0x2c8   : > { %v1043_v48 = vpop.eup %1042  ;;  %v782_v49 = vadd.f32 1.0, %v1041_v47 }
 0x2c9   : > { %v781_v50 = vadd.f32 1.0, %v1043_v48 }
 0x2ca   : > { %1056 = vrcp.f32 %v782_v49 }
 0x2cb   : > { %v1045_v51 = vpop.eup %1044  ;;  %1058 = vrcp.f32 %v781_v50 }
 0x2cc   : > { %v1047_v52 = vpop.eup %1046  ;;  %v784_v53 = vadd.f32 1.0, %v1045_v51 }
 0x2cd   : > { %v1049_v54 = vpop.eup %1048  ;;  %803 = vst.msk [vmem:[%s280_s25 + $0x8] sm:$0xff] %vm801_vm2, %v1047_v52 }
 0x2ce   : > { %v1051_v55 = vpop.eup %1050  ;;  %802 = vst.msk [vmem:[%s280_s25] sm:$0xff] %vm801_vm2, %v1049_v54  ;;  %1060 = vrcp.f32 %v784_v53 }
 0x2cf   : > { %v783_v56 = vadd.f32 1.0, %v1051_v55 }
 0x2d0   : > { %v1053_v57 = vpop.eup %1052 }
 0x2d1   : > { %v1055_v58 = vpop.eup %1054  ;;  %805 = vst.msk [vmem:[%s280_s25 + $0x18] sm:$0xff] %vm801_vm2, %v1053_v57  ;;  %1062 = vrcp.f32 %v783_v56 }
 0x2d2   : > { %804 = vst.msk [vmem:[%s280_s25 + $0x10] sm:$0xff] %vm801_vm2, %v1055_v58 }
 0x2d4   : > { %v1057_v59 = vpop.eup %1056 }
 0x2d5   : > { %v1059_v60 = vpop.eup %1058  ;;  %807 = vst.msk [vmem:[%s280_s25 + $0x28] sm:$0xff] %vm801_vm2, %v1057_v59 }
 0x2d6   : > { %806 = vst.msk [vmem:[%s280_s25 + $0x20] sm:$0xff] %vm801_vm2, %v1059_v60 }
 0x2d8   : > { %v1061_v61 = vpop.eup %1060 }
 0x2d9   : > { %809 = vst.msk [vmem:[%s280_s25 + $0x38] sm:$0xff] %vm801_vm2, %v1061_v61 }
 0x2db   : > { %v1063_v62 = vpop.eup %1062 }
 0x2dc   : > { %808 = vst.msk [vmem:[%s280_s25 + $0x30] sm:$0xff] %vm801_vm2, %v1063_v62 }
 0x2dd PF: > { %s17_s24 = sadd.s32 1, %s1070_s24  }
 0x2de   : > { %p14_p4 = scmp.ge.s32.totalorder %s17_s24, 4  }
 0x2e0   :  { %16 = sbr.rel (!%p14_p4) target bundleno = 1 (0x1), region = 78 }

</bundles_post_ra>
